<compile_context>
chip_gen: v7x
topology: tpu7x:2x2x1
jax: 0.10.0
libtpu: 0.0.40
codegen_flags: <defaults>
</compile_context>

<pallas_src>
import jax
import jax.numpy as jnp
from jax.experimental import pallas as pl
from jax.experimental.pallas import tpu as pltpu


def _round_up(x, m):
    return (x + m - 1) // m * m


def _targetfc_kernel(x_ref, w_ref, b_ref, o_ref):
    # x_ref: (C_in_p, T_HW), w_ref: (C_out_p, C_in_p), b_ref: (C_out_p, 1)
    # o_ref: (C_out_p, T_HW)
    acc = jnp.dot(w_ref[...], x_ref[...], preferred_element_type=jnp.float32)
    o_ref[...] = (acc + b_ref[...]).astype(o_ref.dtype)


def target_fc(input_, weight, bias, *, t_hw=2048):
    """input_: (B, C_in, H, W); weight: (B, C_out, C_in, 1, 1); bias: (B, C_out)."""
    B, C_in, H, W = input_.shape
    C_out = weight.shape[1]
    HW = H * W
    dtype = input_.dtype
    itemsize = jnp.dtype(dtype).itemsize
    # Sublane multiple for the dtype (f32: 8, bf16: 16, int8/fp8: 32).
    sublane = {4: 8, 2: 16, 1: 32}.get(itemsize, 8)

    C_in_p = _round_up(C_in, sublane)
    C_out_p = _round_up(C_out, sublane)

    # Lane-tile selection: multiple of 128, no bigger than the (128-padded) HW,
    # and bounded so the double-buffered in+out tiles stay well under scoped
    # VMEM on every generation (v5e/v6e/v7x).
    hw_128 = _round_up(HW, 128)
    vmem_budget = 16 * 1024 * 1024  # per-step in+out double-buffered footprint cap
    t_cap = vmem_budget // (2 * (C_in_p + C_out_p) * itemsize)
    t_cap = max(128, (t_cap // 128) * 128)
    T_HW = min(_round_up(t_hw, 128), hw_128, t_cap)
    HW_p = _round_up(HW, T_HW)
    n_t = HW_p // T_HW

    # Wrapper-side padding (pure glue; padded channels contribute zeros, padded
    # lanes / C_out rows are sliced off below).
    x = input_.reshape(B, C_in, HW)
    x = jnp.pad(x, ((0, 0), (0, C_in_p - C_in), (0, HW_p - HW)))
    w = weight.reshape(B, C_out, C_in)
    w = jnp.pad(w, ((0, 0), (0, C_out_p - C_out), (0, C_in_p - C_in)))
    b = bias.reshape(B, C_out, 1)
    b = jnp.pad(b, ((0, 0), (0, C_out_p - C_out), (0, 0)))

    cost = pl.CostEstimate(
        flops=2 * B * C_out * C_in * HW,
        bytes_accessed=itemsize * B * (C_in * HW + C_out * HW + C_out * C_in + C_out),
        transcendentals=0,
    )

    out = pl.pallas_call(
        _targetfc_kernel,
        out_shape=jax.ShapeDtypeStruct((B, C_out_p, HW_p), dtype),
        grid_spec=pltpu.PrefetchScalarGridSpec(
            num_scalar_prefetch=0,
            grid=(B, n_t),
            in_specs=[
                # activations: tile along HW
                pl.BlockSpec((pl.Squeezed(), C_in_p, T_HW), lambda bi, ti: (bi, 0, ti)),
                # weight: resident across HW tiles
                pl.BlockSpec((pl.Squeezed(), C_out_p, C_in_p), lambda bi, ti: (bi, 0, 0)),
                # bias: resident across HW tiles
                pl.BlockSpec((pl.Squeezed(), C_out_p, 1), lambda bi, ti: (bi, 0, 0)),
            ],
            out_specs=pl.BlockSpec(
                (pl.Squeezed(), C_out_p, T_HW), lambda bi, ti: (bi, 0, ti)
            ),
        ),
        compiler_params=pltpu.CompilerParams(
            # Both axes independent (K = C_in fits in one block, no reduction
            # across grid steps) -> shardable across v7x's two TensorCores.
            dimension_semantics=("parallel", "parallel"),
            vmem_limit_bytes=64 * 1024 * 1024,
        ),
        cost_estimate=cost,
    )(x, w, b)

    return out[:, :C_out, :HW].reshape(B, C_out, H, W)


if __name__ == "__main__":
    # Small, TPU-friendly shapes consistent with the module.
    B, C_in, C_out, H, W = 2, 16, 8, 16, 16

    key = jax.random.PRNGKey(0)
    k1, k2, k3 = jax.random.split(key, 3)
    x = jax.random.normal(k1, (B, C_in, H, W), dtype=jnp.float32)
    weight = jax.random.normal(k2, (B, C_out, C_in, 1, 1), dtype=jnp.float32) * 0.1
    bias = jax.random.normal(k3, (B, C_out), dtype=jnp.float32) * 0.1

    out = jax.block_until_ready(target_fc(x, weight, bias))

    # Reference: per-batch 1x1 conv == einsum over channel axis + bias broadcast.
    ref = jnp.einsum("boi,bihw->bohw", weight[:, :, :, 0, 0], x) + bias[:, :, None, None]
    assert out.shape == (B, C_out, H, W)
    assert jnp.allclose(out, ref, atol=1e-4, rtol=1e-4), "mismatch vs reference"

    print("KERNEL_OK")
</pallas_src>

<mosaic_0001>
module attributes {stable_mosaic.version = 11 : i64} {
  func.func @_targetfc_kernel(%arg0: i32, %arg1: i32, %arg2: memref<1x16x256xf32, #tpu.memory_space<vmem>>, %arg3: memref<1x8x16xf32, #tpu.memory_space<vmem>>, %arg4: memref<1x8x1xf32, #tpu.memory_space<vmem>>, %arg5: memref<1x8x256xf32, #tpu.memory_space<vmem>>) attributes {dimension_semantics = [#tpu.dimension_semantics<parallel>, #tpu.dimension_semantics<parallel>], iteration_bounds = array<i64: 2, 1>, scalar_prefetch = 0 : i64, scratch_operands = 0 : i64, tpu.core_type = #tpu.core_type<tc>, window_params = [{transform_indices = @transform_0, window_bounds = array<i64: 1, 16, 256>}, {transform_indices = @transform_1, window_bounds = array<i64: 1, 8, 16>}, {transform_indices = @transform_2, window_bounds = array<i64: 1, 8, 1>}, {transform_indices = @transform_3, window_bounds = array<i64: 1, 8, 256>}]} {
    %c0 = arith.constant 0 : index
    %c0_0 = arith.constant 0 : index
    %c0_1 = arith.constant 0 : index
    %0 = vector.load %arg3[%c0, %c0_0, %c0_1] : memref<1x8x16xf32, #tpu.memory_space<vmem>>, vector<1x8x16xf32>
    %1 = vector.shape_cast %0 : vector<1x8x16xf32> to vector<8x16xf32>
    %c0_2 = arith.constant 0 : index
    %c0_3 = arith.constant 0 : index
    %c0_4 = arith.constant 0 : index
    %2 = vector.load %arg2[%c0_2, %c0_3, %c0_4] : memref<1x16x256xf32, #tpu.memory_space<vmem>>, vector<1x16x256xf32>
    %3 = vector.shape_cast %2 : vector<1x16x256xf32> to vector<16x256xf32>
    %cst = arith.constant dense<0.000000e+00> : vector<8x256xf32>
    %4 = tpu.matmul %1, %3, %cst {dimension_numbers = #tpu.dot_dimension_numbers<[1], [0], [0], [1], [0, 0, 1, 1], [], []>} : vector<8x16xf32>, vector<16x256xf32>, vector<8x256xf32> -> vector<8x256xf32>
    %c0_5 = arith.constant 0 : index
    %c0_6 = arith.constant 0 : index
    %c0_7 = arith.constant 0 : index
    %5 = vector.load %arg4[%c0_5, %c0_6, %c0_7] : memref<1x8x1xf32, #tpu.memory_space<vmem>>, vector<1x8x1xf32>
    %6 = vector.shape_cast %5 : vector<1x8x1xf32> to vector<8x1xf32>
    %7 = vector.broadcast %6 : vector<8x1xf32> to vector<8x256xf32>
    %8 = arith.addf %4, %7 : vector<8x256xf32>
    %c0_8 = arith.constant 0 : index
    %c0_9 = arith.constant 0 : index
    %c0_10 = arith.constant 0 : index
    %9 = vector.load %arg5[%c0_8, %c0_9, %c0_10] : memref<1x8x256xf32, #tpu.memory_space<vmem>>, vector<1x8x256xf32>
    %10 = vector.shape_cast %9 : vector<1x8x256xf32> to vector<8x256xf32>
    %11 = vector.shape_cast %8 : vector<8x256xf32> to vector<1x8x256xf32>
    tpu.vector_store %arg5[%c0_8, %c0_9, %c0_10], %11 {strides = array<i32>} : memref<1x8x256xf32, #tpu.memory_space<vmem>>, vector<1x8x256xf32>,
    return
  }
  func.func @transform_0(%arg0: i32, %arg1: i32) -> (i32, i32, i32) {
    %c0_i32 = arith.constant 0 : i32
    %c0_i32_0 = arith.constant 0 : i32
    return %arg0, %c0_i32, %arg1 : i32, i32, i32
  }
  func.func @transform_1(%arg0: i32, %arg1: i32) -> (i32, i32, i32) {
    %c0_i32 = arith.constant 0 : i32
    %c0_i32_0 = arith.constant 0 : i32
    %c0_i32_1 = arith.constant 0 : i32
    return %arg0, %c0_i32, %c0_i32_0 : i32, i32, i32
  }
  func.func @transform_2(%arg0: i32, %arg1: i32) -> (i32, i32, i32) {
    %c0_i32 = arith.constant 0 : i32
    %c0_i32_0 = arith.constant 0 : i32
    %c0_i32_1 = arith.constant 0 : i32
    return %arg0, %c0_i32, %c0_i32_0 : i32, i32, i32
  }
  func.func @transform_3(%arg0: i32, %arg1: i32) -> (i32, i32, i32) {
    %c0_i32 = arith.constant 0 : i32
    %c0_i32_0 = arith.constant 0 : i32
    return %arg0, %c0_i32, %arg1 : i32, i32, i32
  }
}

</mosaic_0001>

<bundles_post_ra>
// kernel: tpu_custom_call.1
= control target key start
LH: loop header
LB: loop body
LE: loop exit
PB: predicated region body
PF: predicated region fallthrough
CT: control target
= control target key end

     0   :  { %s1077_s0 = inlined_call_operand.hbm [shape: f32[2,16,256], index: 0, kind: input, shape index: {}]   ;;  %s1078_s1 = inlined_call_operand.hbm [shape: f32[2,8,16], index: 1, kind: input, shape index: {}]   ;;  %s1079_s2 = inlined_call_operand.hbm [shape: f32[2,8,1], index: 2, kind: input, shape index: {}]   ;;  %s1080_s3 = inlined_call_operand.hbm [shape: f32[2,8,256], index: 3, kind: output, shape index: {}]  }
   0x1   :  { %1087 = sst [smem:[#allocation15_spill]] %s1077_s0 }
   0x2   :  { %1088 = sst [smem:[#allocation16_spill]] %s1078_s1 }
   0x3   :  { %8 = vsyncpa [#allocation3], 0 }
   0x4   :  { %10 = vsyncpa [#allocation3 + $0x1], 0 }
   0x5   :  { %11 = vsyncpa [#allocation6], 0 }
   0x6   :  { %13 = vsyncpa [#allocation6 + $0x1], 0 }
   0x7   :  { %14 = vsyncpa [#allocation4], 0 }
   0x8   :  { %16 = vsyncpa [#allocation4 + $0x1], 0  ;;  %s823_s12 = smov 0   ;;  %s825_s13 = smov 0  }
   0x9   :  { %s827_s14 = smov 0   ;;  %s829_s15 = smov 0  }
   0xa   :  { %s831_s16 = smov 0   ;;  %s833_s17 = smov 0  }
   0xb LB: > { %1089 = sst [smem:[#allocation12_spill]] %s789_s16  ;;  %s854_s18 = sadd.s32 4294967295, %s793_s17   ;;  %s793_s17 = sphi %s833_s17, %s22_s17   ;;  %s789_s16 = sphi %s831_s16, %s1110_s16   ;;  %s785_s15 = sphi %s829_s15, %s1109_s15   ;;  %s781_s14 = sphi %s827_s14, %s1113_s14   ;;  %s777_s13 = sphi %s825_s13, %s1112_s13   ;;  %s773_s12 = sphi %s823_s12, %s1111_s12  }
   0xc   : > { %s513_s19 = sadd.s32 4294967294, %s793_s17   ;;  %s34_s20 = sadd.s32 1, %s789_s16 }
   0xd   : > { %s43_s21 = sadd.s32 1, %s781_s14  ;;  %p36_p0 = scmp.ge.s32.totalorder %s34_s20, 2 }
   0xe   : > { %p50_p1 = scmp.ne.s32.totalorder %s781_s14, %s777_s13  ;;  %p51_p2 = scmp.eq.s32.totalorder %s793_s17, 0 }
   0xf   : > { %p56_p3 = scmp.ne.s32.totalorder %s777_s13, %s773_s12  ;;  %s1115_s20 = smov (%p36_p0, %s34_s20), 0 }
  0x10   : > { %1090 = sst [smem:[#allocation13_spill]] %s1115_s20  ;;  %p866_p4 = por %p51_p2, %p50_p1 }
  0x11   : > { %p57_p5 = scmp.eq.s32.totalorder %s854_s18, 0  ;;  %s38_s23 = ssub.s32 %s789_s16, %s1115_s20 }
  0x12   : > { %p134_p6 = scmp.eq.s32.totalorder %s854_s18, 1  ;;  %p41_p7 = scmp.eq.s32.totalorder %s38_s23, 0 }
  0x13   : > { %p874_p8 = por %p57_p5, %p56_p3  ;;  %p140_p10 = scmp.eq.s32.totalorder %s513_s19, 1 }
  0x14   : > { %p878_p9 = por %p134_p6, %p50_p1  ;;  %p562_p13 = scmp.lt.s32.totalorder %s793_s17, 2 }
  0x15   : > { %s1092_s24 = scalar_select %p874_p8, 1, 0 }
  0x16   : > { %s1093_s25 = scalar_select %p878_p9, 1, 0 }
  0x17   : > { %s883_s26 = scalar_select %p41_p7, %s781_s14, %s43_s21  }
  0x18   : > { %p885_p11 = por %p140_p10, %p56_p3  ;;  %s892_s28 = sand.u32 1, %s781_s14  }
  0x19   : > { %1094 = sst [smem:[#allocation14_spill]] %s883_s26  ;;  %s183_s29 = sand.u32 1, %s793_s17  }
  0x1a   : > { %s1095_s27 = scalar_select %p885_p11, 1, 0 }
  0x1b   : > { %s1081_s30 = sshll.u32 %s892_s28, 3  ;;  %p898_p0 = pnand %p562_p13, %p866_p4 }
  0x1c   : > { %s520_s5 = sshll.u32 %s789_s16, 7  ;;  %s1097_s1 = sld [smem:[#allocation16_spill]] }
  0x1d   : > { %s1096_s4 = scalar_select %p898_p0, 1, 0 }
  0x1e   : > { %s187_s9 = scalar_lea.vmem [#allocation5], %s1081_s30  ;;  %s915_s21 = scalar_lea.hbm %s1079_s2, %s520_s5 }
  0x1f   : > { %s194_s10 = sshll.u32 %s187_s9, 4  ;;  %s917_s22 = scalar_lea.sflag [#allocation6], %s183_s29  ;;  %s910_s10 = int_to_ptr.vmem [resolvable:$true] %s194_s10 }
  0x20   : > { %p923_p2 = pneg %p898_p0 }
  0x22   : > { %s906_s8 = scalar_lea.hbm %s1097_s1, %s520_s5  ;;  %s622_s30 = scalar_lea.hbm %s1097_s1, 256 }
  0x23   : > { %s617_s23 = scalar_lea.hbm %s906_s8, 128  ;;  %p623_p5 = scmp.lt.u32.totalorder %s906_s8, %s1097_s1 }
  0x24   : > { %p618_p1 = scmp.ne.s32.totalorder %s906_s8, %s617_s23  ;;  %p624_p6 = scmp.lt.u32.totalorder %s622_s30, %s617_s23 }
  0x25   : > { %p626_p10 = scmp.lt.u32.totalorder %s617_s23, %s906_s8 }
  0x26   : > { %p620_p3 = pnand %p923_p2, %p618_p1  ;;  %p625_p7 = por %p624_p6, %p623_p5 }
  0x28   : > { %p621_p4 = pneg %p620_p3  ;;  %p627_p13 = por %p626_p10, %p625_p7 }
  0x2a   : > { %p628_p12 = pnand %p627_p13, %p621_p4 }
  0x2c   : > { %631 = shalt.err (!%p628_p12)
}
  0x2d   : > { %s632_s29 = scalar_lea.vmem %s910_s10, 128  ;;  %s795_s19 = smov [#allocation5]  }
  0x2e   : > { %p633_p1 = scmp.ne.s32.totalorder %s910_s10, %s632_s29  ;;  %s637_s7 = sshll.u32 %s795_s19, 4  ;;  %s638_s7 = int_to_ptr.vmem [resolvable:$false] %s637_s7 }
  0x2f   : > { %s639_s9 = scalar_lea.vmem %s638_s7, 256  ;;  %p640_p9 = scmp.lt.s32.totalorder %s910_s10, %s638_s7 }
  0x30   : > { %p635_p3 = pnand %p633_p1, %p923_p2  ;;  %p641_p8 = scmp.lt.s32.totalorder %s639_s9, %s632_s29 }
  0x32   : > { %p636_p11 = pneg %p635_p3  ;;  %p642_p5 = por %p641_p8, %p640_p9 }
  0x34   : > { %p643_p6 = pnand %p642_p5, %p636_p11 }
  0x36   : > { %646 = shalt.err (!%p643_p6)
}
  0x37   : > { %554 = dma.hbm_to_vmem [thread:$0]  (!%p898_p0), %s906_s8, 128, %s910_s10, %s917_s22  }
  0x38   : > { %p523_p12 = scmp.ge.s32.totalorder %s793_s17, 1  ;;  %p217_p4 = scmp.lt.s32.totalorder %s793_s17, 3 }
  0x39   : > { %s516_s23 = sshll.u32 %s892_s28, 5  ;;  %s534_s11 = sshll.u32 %s789_s16, 9 }
  0x3a   : > { %p949_p7 = pnand %p523_p12, %p217_p4  ;;  %s1100_s0 = sld [smem:[#allocation15_spill]] }
  0x3b   : > { %s164_s7 = scalar_lea.vmem [#allocation2], %s516_s23  ;;  %s161_s8 = scalar_lea.sflag [#allocation3], %s892_s28 }
  0x3c   : > { %s1099_s30 = scalar_select %p949_p7, 1, 0 }
  0x3d   : > { %s173_s9 = sshll.u32 %s164_s7, 4  ;;  %s960_s9 = int_to_ptr.vmem [resolvable:$true] %s173_s9 }
  0x40   : > { %s958_s19 = scalar_lea.hbm %s1100_s0, %s534_s11  ;;  %s652_s5 = scalar_lea.hbm %s1100_s0, 1024 }
  0x41   : > { %s647_s10 = scalar_lea.hbm %s958_s19, 512  ;;  %p653_p10 = scmp.lt.u32.totalorder %s958_s19, %s1100_s0 }
  0x42   : > { %p648_p8 = scmp.ne.s32.totalorder %s958_s19, %s647_s10  ;;  %p654_p13 = scmp.lt.u32.totalorder %s652_s5, %s647_s10 }
  0x43   : > { %p656_p3 = scmp.lt.u32.totalorder %s647_s10, %s958_s19 }
  0x44   : > { %p650_p9 = pnand %p648_p8, %p923_p2  ;;  %p655_p1 = por %p654_p13, %p653_p10 }
  0x46   : > { %p651_p11 = pneg %p650_p9  ;;  %p657_p5 = por %p656_p3, %p655_p1 }
  0x48   : > { %p658_p6 = pnand %p657_p5, %p651_p11 }
  0x4a   : > { %661 = shalt.err (!%p658_p6)
}
  0x4b   : > { %s662_s23 = scalar_lea.vmem %s960_s9, 512  ;;  %s796_s1 = smov [#allocation2]  }
  0x4c   : > { %p663_p12 = scmp.ne.s32.totalorder %s960_s9, %s662_s23  ;;  %s667_s20 = sshll.u32 %s796_s1, 4  ;;  %s668_s20 = int_to_ptr.vmem [resolvable:$false] %s667_s20 }
  0x4d   : > { %s669_s7 = scalar_lea.vmem %s668_s20, 1024  ;;  %p670_p9 = scmp.lt.s32.totalorder %s960_s9, %s668_s20 }
  0x4e   : > { %p665_p4 = pnand %p663_p12, %p923_p2  ;;  %p671_p7 = scmp.lt.s32.totalorder %s669_s7, %s662_s23 }
  0x50   : > { %p666_p8 = pneg %p665_p4  ;;  %p672_p10 = por %p671_p7, %p670_p9 }
  0x52   : > { %p673_p13 = pnand %p672_p10, %p666_p8 }
  0x54   : > { %676 = shalt.err (!%p673_p13)
}
  0x55   : > { %s797_s10 = smov 256   ;;  %s798_s5 = smov 16  }
  0x56   : > { %551 = dma.hbm_to_vmem [thread:$0]  (!%p898_p0), %s958_s19, 512, %s960_s9, %s161_s8, %s797_s10, %s797_s10, %s798_s5  }
  0x57   : > { %s1101_s11 = sshll.u32 %s892_s28, 3  ;;  %s677_s1 = scalar_lea.hbm %s915_s21, 128 }
  0x58   : > { %s205_s29 = scalar_lea.vmem [#allocation7], %s1101_s11  ;;  %p678_p7 = scmp.ne.s32.totalorder %s915_s21, %s677_s1 }
  0x59   : > { %s212_s23 = sshll.u32 %s205_s29, 4  ;;  %s682_s0 = scalar_lea.hbm %s1079_s2, 256  ;;  %s213_s23 = int_to_ptr.vmem [resolvable:$true] %s212_s23 }
  0x5a   : > { %p680_p11 = pnand %p678_p7, %p923_p2  ;;  %p683_p3 = scmp.lt.u32.totalorder %s915_s21, %s1079_s2 }
  0x5b   : > { %p684_p5 = scmp.lt.u32.totalorder %s682_s0, %s677_s1  ;;  %p686_p12 = scmp.lt.u32.totalorder %s677_s1, %s915_s21 }
  0x5c   : > { %p681_p1 = pneg %p680_p11 }
  0x5d   : > { %p685_p6 = por %p684_p5, %p683_p3 }
  0x5f   : > { %p687_p4 = por %p686_p12, %p685_p6 }
  0x61   : > { %p688_p8 = pnand %p687_p4, %p681_p1 }
  0x63   : > { %691 = shalt.err (!%p688_p8)
}
  0x64   : > { %s692_s28 = scalar_lea.vmem %s213_s23, 128  ;;  %s799_s19 = smov [#allocation7]  }
  0x65   : > { %p693_p9 = scmp.ne.s32.totalorder %s213_s23, %s692_s28  ;;  %s697_s9 = sshll.u32 %s799_s19, 4  ;;  %s698_s9 = int_to_ptr.vmem [resolvable:$false] %s697_s9 }
  0x66   : > { %s699_s8 = scalar_lea.vmem %s698_s9, 256  ;;  %p700_p7 = scmp.lt.s32.totalorder %s213_s23, %s698_s9 }
  0x67   : > { %p695_p10 = pnand %p693_p9, %p923_p2  ;;  %p701_p11 = scmp.lt.s32.totalorder %s699_s8, %s692_s28 }
  0x69   : > { %p696_p13 = pneg %p695_p10  ;;  %p702_p0 = por %p701_p11, %p700_p7 }
  0x6b   : > { %p703_p3 = pnand %p702_p0, %p696_p13 }
  0x6d   : > { %706 = shalt.err (!%p703_p3)
}
  0x6e   : > { %p1102_p5 = scmp.ne.s32.totalorder %s1096_s4, 0  ;;  %p1103_p1 = scmp.ne.s32.totalorder %s1099_s30, 0 }
  0x6f   : > { %s1009_s0 = sand.u32 (!%p1103_p1), 1, %s777_s13   ;;  %p1104_p2 = scmp.ne.s32.totalorder (!%p1103_p1), %s1092_s24, 0 }
  0x70   : > { %557 = dma.hbm_to_vmem [thread:$0]  (!%p1102_p5), %s915_s21, 128, %s213_s23, %s917_s22  }
  0x71   : > { %221 = sbr.rel (%p1103_p1) target bundleno = 360 (0x168), region = 32  ;;  %s524_s16 = sshll.u32 (!%p1103_p1), %s1009_s0, 5 }
  0x72   : > { %s224_s26 = scalar_lea.sflag (!%p1103_p1), [#allocation3], %s1009_s0  ;;  %s227_s6 = scalar_lea.vmem (!%p1103_p1), [#allocation2], %s524_s16 }
  0x78   : > { %760 = dma.done.wait (%p1104_p2), %s224_s26, 512  }
  0x79   : > { %762 = vsyncadd (%p1104_p2), %s224_s26, 4294966784  ;;  %s232_s4 = sand.u32 1, %s854_s18   ;;  %s525_s21 = sshll.u32 %s1009_s0, 3 }
  0x7a   : > { %s233_s22 = scalar_lea.sflag [#allocation6], %s232_s4  ;;  %s236_s30 = scalar_lea.vmem [#allocation5], %s525_s21 }
  0x7b   : > { %764 = dma.done.wait (%p1104_p2), %s233_s22, 256  }
  0x7c   : > { %766 = vsyncadd (%p1104_p2), %s233_s22, 4294967040  ;;  %v800_v0 = vmov 0.0   ;;  %v801_v1 = vmov 0   ;;  %v282_v2 = vld [vmem:[%s227_s6 + $0x8] sm:$0xff]  ;;  %v284_v3 = vld [vmem:[%s227_s6 + $0x18] sm:$0xff]  ;;  %s245_s18 = scalar_lea.vmem [#allocation7], %s525_s21 }
  0x7d   : > { %359 = vmatprep.mubr.f32.mxu0 %v800_v0  ;;  %616 = vset.pattern.permute.xlu0 %v801_v1  ;;  %v281_v4 = vld [vmem:[%s227_s6] sm:$0xff]  ;;  %v536_v5 = vpack.c.bf16 %v284_v3, %v282_v2  ;;  %v283_v6 = vld [vmem:[%s227_s6 + $0x10] sm:$0xff]  ;;  %vm291_vm0 = vcmask 130048   ;;  %s527_s24 = sshll.u32 %s1009_s0, 4  ;;  %s535_s10 = sshll.u32 %s785_s15, 8 }
  0x7e   : > { %v285_v7 = vld [vmem:[%s245_s18] sm:$0xff]  ;;  %v538_v8 = vpack.c.bf16 %v283_v6, %v281_v4  ;;  %v280_v9 = vld [vmem:[%s236_s30] sm:$0xff]  ;;  %s277_s5 = scalar_lea.vmem [#allocation8], %s527_s24  ;;  %s1028_s1 = scalar_lea.hbm %s1080_s3, %s535_s10 }
  0x7f   : > { %288 = vperm.xlu0 %616, %v285_v7   ;;  %537 = vmatprep.subr.bf16.mxu0 %v536_v5  ;;  %s385_s11 = sshll.u32 %s277_s5, 4  ;;  %s369_s20 = scalar_lea.sflag [#allocation4], %s1009_s0  ;;  %s1030_s11 = int_to_ptr.vmem [resolvable:$true] %s385_s11 }
  0x80   : > { %539 = vmatpush1.bf16.msra.mxu0 %v538_v8  ;;  %s707_s15 = scalar_lea.vmem %s1030_s11, 256  ;;  %p1105_p6 = scmp.ne.s32.totalorder %s1093_s25, 0 }
  0x81   : > { %p708_p0 = scmp.ne.s32.totalorder %s1030_s11, %s707_s15  ;;  %s802_s7 = smov [#allocation8]  }
  0x82   : > { %s711_s28 = sshll.u32 %s802_s7, 4  ;;  %s712_s28 = int_to_ptr.vmem [resolvable:$false] %s711_s28 }
  0x83   : > { %528 = vmatmul.mubr.msk.f32.vlgmr.msra.gmra.mrb[0].mxu0 %vm291_vm0, %v280_v9  ;;  %p709_p12 = pnand %p708_p0, %p1105_p6  ;;  %s713_s19 = scalar_lea.vmem %s712_s28, 512 }
  0x84   : > { %p714_p8 = scmp.lt.s32.totalorder %s1030_s11, %s712_s28  ;;  %p715_p9 = scmp.lt.s32.totalorder %s713_s19, %s707_s15 }
  0x85   : > { %p710_p4 = pneg %p709_p12 }
  0x86   : > { %p716_p10 = por %p715_p9, %p714_p8 }
  0x88   : > { %p717_p13 = pnand %p716_p10, %p710_p4 }
  0xfe   : > { %v289_v10 = vpop.permute.xlu0 %288 }
 0x156   : > { %v361_v11 = vpop.f32.mrb[0].mxu0 }
 0x157   : > { %v362_v12 = vadd.f32 %v361_v11, %v289_v10  ;;  %v363_v13 = vpop.f32.mrb[1].mxu0 }
 0x158   : > { %v364_v14 = vadd.f32 %v363_v13, %v289_v10 }
 0x159   : > { %366 = vst [vmem:[%s277_s5] sm:$0xff] %v362_v12 }
 0x15a   : > { %367 = vst [vmem:[%s277_s5 + $0x8] sm:$0xff] %v364_v14 }
 0x15b   : > { %720 = shalt.err (!%p717_p13)
}
 0x15c   : > { %s721_s9 = scalar_lea.hbm %s1028_s1, 256  ;;  %s725_s16 = scalar_lea.hbm %s1080_s3, 512 }
 0x15d   : > { %p722_p7 = scmp.ne.s32.totalorder %s1028_s1, %s721_s9  ;;  %p726_p5 = scmp.lt.u32.totalorder %s1028_s1, %s1080_s3 }
 0x15e   : > { %p727_p1 = scmp.lt.u32.totalorder %s725_s16, %s721_s9  ;;  %p729_p0 = scmp.lt.u32.totalorder %s721_s9, %s1028_s1 }
 0x15f   : > { %p723_p11 = pnand %p722_p7, %p1105_p6 }
 0x160   : > { %p728_p2 = por %p727_p1, %p726_p5 }
 0x161   : > { %p724_p3 = pneg %p723_p11 }
 0x162   : > { %p730_p12 = por %p729_p0, %p728_p2 }
 0x164   : > { %p731_p4 = pnand %p730_p12, %p724_p3 }
 0x166   : > { %734 = shalt.err (!%p731_p4)
}
 0x167   : > { %546 = dma.vmem_to_hbm [thread:$0]  (%p1105_p6), %s1030_s11, 256, %s1028_s1, %s369_s20  }
 0x168 PF: > { %s397_s4 = sand.u32 1, %s773_s12   ;;  %p1106_p8 = scmp.ne.s32.totalorder %s1095_s27, 0 }
 0x169   : > { %p1107_p9 = scmp.ge.s32.totalorder %s793_s17, 2  ;;  %s398_s21 = scalar_lea.sflag [#allocation4], %s397_s4 }
 0x16b   : > { %p559_p10 = pnand %p1107_p9, %p1106_p8 }
 0x16d   : > { %768 = dma.done.wait (!%p559_p10), %s398_s21, 256  }
 0x16e   : > { %770 = vsyncadd (!%p559_p10), %s398_s21, 4294967040  ;;  %s22_s17 = sadd.s32 1, %s793_s17   ;;  %s1108_s25 = sld [smem:[#allocation14_spill]] }
 0x16f   : > { %p19_p13 = scmp.ge.s32.totalorder %s22_s17, 4   ;;  %s1109_s15 = sld [smem:[#allocation12_spill]] }
 0x170   : > { %s1110_s16 = sld [smem:[#allocation13_spill]]  ;;  %s1111_s12 = smov %s777_s13 }
 0x171   : > { %s1112_s13 = smov %s781_s14  ;;  %21 = sbr.rel (!%p19_p13) target bundleno = 11 (0xb), region = 101 }
 0x174   : > { %s1113_s14 = smov %s1108_s25 }
 0x178   :  { %403 = vsyncpa [#allocation3], 1 }
 0x179   :  { %405 = vsyncpa [#allocation3 + $0x1], 1 }
 0x17a   :  { %406 = vsyncpa [#allocation6], 1 }
 0x17b   :  { %408 = vsyncpa [#allocation6 + $0x1], 1 }
 0x17c   :  { %409 = vsyncpa [#allocation4], 1 }
 0x17d   :  { %411 = vsyncpa [#allocation4 + $0x1], 1 }

</bundles_post_ra>
